<compile_context>
chip_gen: v7x
topology: tpu7x:2x2x1
jax: 0.10.0
libtpu: 0.0.40
codegen_flags: <defaults>
</compile_context>

<pallas_src>
import functools

import jax
import jax.numpy as jnp
from jax.experimental import pallas as pl
from jax.experimental.pallas import tpu as pltpu


def _round_up(x, m):
    return ((x + m - 1) // m) * m


def _vmem_capacity_bytes():
    """Per-core VMEM capacity; conservative (v7x, 64 MiB) fallback on failure."""
    try:
        return int(pltpu.get_tpu_info().vmem_capacity_bytes)
    except Exception:
        return 64 << 20


def _vmem_footprint(nb, S, H, npad):
    """Rough per-step VMEM working set (bytes) for the pipelined kernel."""
    f32, bf16 = 4, 2
    m = nb * S
    io = 2 * (2 * m * H * f32)                     # sem + temp tiles, double-buffered
    outs = 2 * (m * H * f32 + nb * S * f32)        # fused + mean tiles, double-buffered
    wts = 2 * (2 * H * npad * bf16) + npad * f32   # ws/wt (2 buffers) + bias
    tmp = m * npad * f32 + 2 * nb * S * S * f32 + 8 * m * f32  # proj, scores/p, row vecs
    return io + outs + wts + tmp


def _pick_batch_block(B, S, H, npad, vmem_cap):
    """Batch elements per grid step.

    Keep at least min(B, 4) grid steps (pipeline overlap + both v7x cores),
    prefer an even step count, feed the MXU a tall M (= NB*S rows: ~512 on
    128 MiB parts, ~256 on 64 MiB parts), and stay within ~1/3 of VMEM.
    """
    budget = vmem_cap // 3
    target_rows = 512 if vmem_cap >= (96 << 20) else 256
    min_steps = min(B, 4)
    cands = [nb for nb in range(1, B + 1)
             if B % nb == 0
             and B // nb >= min_steps
             and nb * S <= max(target_rows, S)
             and _vmem_footprint(nb, S, H, npad) <= budget]
    if not cands:
        return 1
    even = [nb for nb in cands if (B // nb) % 2 == 0 or nb == 1]
    return max(even or cands)


def _gated_attn_kernel(sem_ref, temp_ref, ws_ref, wt_ref, b_ref,
                       fused_ref, mean_ref, *, nb, seq, hidden, flat_out):
    H, S = hidden, seq
    M = nb * S

    sem = sem_ref[...]                                   # (nb, S, H) float32
    # NOTE: the merge/split reshapes below are layout-free when S % 8 == 0 and
    # value-correct otherwise (Mosaic inserts a relayout).
    x_s = sem.reshape(M, H).astype(jnp.bfloat16)
    x_t = temp_ref[...].reshape(M, H).astype(jnp.bfloat16)

    # Fused q|k|v|gate projection: bf16 operands, f32 accumulation on the MXU.
    proj = jnp.dot(x_s, ws_ref[...], preferred_element_type=jnp.float32)
    proj = proj + jnp.dot(x_t, wt_ref[...], preferred_element_type=jnp.float32)
    proj = proj + b_ref[...]                             # (M, Npad) f32

    q = proj[:, 0 * H:1 * H].reshape(nb, S, H).astype(jnp.bfloat16)  # pre-scaled by 1/sqrt(H)
    k = proj[:, 1 * H:2 * H].reshape(nb, S, H).astype(jnp.bfloat16)
    v = proj[:, 2 * H:3 * H].reshape(nb, S, H).astype(jnp.bfloat16)
    g_logit = proj[:, 3 * H:3 * H + 1].reshape(nb, S, 1)             # f32

    # Scores already include the 1/sqrt(H) factor (folded into q weights/bias).
    scores = jnp.einsum('bqc,bkc->bqk', q, k,
                        preferred_element_type=jnp.float32)          # (nb,S,S) f32
    m = jnp.max(scores, axis=-1, keepdims=True)
    p = jnp.exp(scores - m)
    denom = jnp.sum(p, axis=-1, keepdims=True)

    # Softmax normalizer and sigmoid gate combined into one per-row scale; the
    # gated (nb,S,S) attention matrix is never materialized. Exact divide on a
    # tiny (nb,S,1) tensor (no approx-reciprocal error).
    w_row = jax.nn.sigmoid(g_logit) / denom                          # (nb,S,1)

    pv = jnp.einsum('bqk,bkc->bqc', p.astype(jnp.bfloat16), v,
                    preferred_element_type=jnp.float32)              # (nb,S,H)
    fused = pv * w_row + sem
    if flat_out:
        # Lane-dense store: (nb, 1, S*H) instead of masked sub-128 row writes.
        fused_ref[...] = fused.reshape(nb, 1, S * H).astype(fused_ref.dtype)
    else:
        fused_ref[...] = fused.astype(fused_ref.dtype)

    # attn_weights.mean(dim=1): gate-weighted column mean of p over the query
    # axis as a small batched (1,S)x(S,S) contraction (no extra (nb,S,S) temp).
    mean = jnp.einsum('bxq,bqk->bxk', w_row.reshape(nb, 1, S), p,
                      preferred_element_type=jnp.float32) * (1.0 / S)
    mean_ref[...] = mean.astype(mean_ref.dtype)

    # TODO(synk): for very large S (nb*S*S*4B temporaries near the VMEM budget)
    # replace the materialized scores/p with a flash-style online-softmax loop
    # over k-blocks.


def gated_spatio_temp_attention(sem, temp, params, *, batch_block=None):
    """sem, temp: (B, S, H) float32. Returns (fused (B,S,H), attn_mean (B,S))."""
    B, S, H = sem.shape
    wq, bq, wk, bk, wv, bv, wg, bg = params

    npad = _round_up(3 * H + 1, 128)          # q|k|v|gate packed contiguously
    scale = 1.0 / float(H) ** 0.5             # torch: scores / sqrt(hidden_dim)

    def pack_w(rows):
        w = jnp.zeros((H, npad), jnp.float32)
        w = w.at[:, 0 * H:1 * H].set(wq[rows].astype(jnp.float32) * scale)
        w = w.at[:, 1 * H:2 * H].set(wk[rows].astype(jnp.float32))
        w = w.at[:, 2 * H:3 * H].set(wv[rows].astype(jnp.float32))
        w = w.at[:, 3 * H:3 * H + 1].set(wg[rows].astype(jnp.float32))
        return w.astype(jnp.bfloat16)         # bf16 MXU operand, half the DMA

    ws = pack_w(slice(0, H))                  # "sem" half of every Linear
    wt = pack_w(slice(H, 2 * H))              # "temp" half of every Linear

    bias = jnp.zeros((1, npad), jnp.float32)  # added post-accumulate: keep f32
    bias = bias.at[0, 0 * H:1 * H].set(bq.astype(jnp.float32) * scale)
    bias = bias.at[0, 1 * H:2 * H].set(bk.astype(jnp.float32))
    bias = bias.at[0, 2 * H:3 * H].set(bv.astype(jnp.float32))
    bias = bias.at[0, 3 * H].set(bg.astype(jnp.float32)[0])

    vmem_cap = _vmem_capacity_bytes()
    NB = batch_block if batch_block is not None else _pick_batch_block(
        B, S, H, npad, vmem_cap)
    assert B % NB == 0, "batch_block must divide the batch size"
    vmem_limit = int(min(max(2 * _vmem_footprint(NB, S, H, npad), 32 << 20),
                         (vmem_cap * 3) // 4))

    flat_out = (H % 128) != 0                 # lane-dense stores for sub-128 H
    kernel = functools.partial(_gated_attn_kernel, nb=NB, seq=S, hidden=H,
                               flat_out=flat_out)

    x_spec = pl.BlockSpec((NB, S, H), lambda b: (b, 0, 0))
    # Constant index_maps -> weight/bias blocks are DMA'd once and re-used.
    w_spec = pl.BlockSpec((H, npad), lambda b: (0, 0))
    b_spec = pl.BlockSpec((1, npad), lambda b: (0, 0))

    if flat_out:
        fused_shape = jax.ShapeDtypeStruct((B, 1, S * H), sem.dtype)
        fused_spec = pl.BlockSpec((NB, 1, S * H), lambda b: (b, 0, 0))
    else:
        fused_shape = jax.ShapeDtypeStruct((B, S, H), sem.dtype)
        fused_spec = pl.BlockSpec((NB, S, H), lambda b: (b, 0, 0))

    fused, attn_mean = pl.pallas_call(
        kernel,
        grid=(B // NB,),
        in_specs=[x_spec, x_spec, w_spec, w_spec, b_spec],
        out_specs=[fused_spec,
                   pl.BlockSpec((NB, 1, S), lambda b: (b, 0, 0))],
        out_shape=(fused_shape,
                   jax.ShapeDtypeStruct((B, 1, S), jnp.float32)),
        compiler_params=pltpu.CompilerParams(
            dimension_semantics=("parallel",),
            vmem_limit_bytes=vmem_limit),
    )(sem, temp, ws, wt, bias)

    if flat_out:
        fused = fused.reshape(B, S, H)
    return fused, attn_mean.reshape(B, S)


if __name__ == "__main__":
    B, S, H = 2, 8, 32
    key = jax.random.PRNGKey(0)
    ks = jax.random.split(key, 10)

    # Deterministic init matching nn.Linear's uniform(-1/sqrt(fan_in), 1/sqrt(fan_in)).
    bound = 1.0 / float(jnp.sqrt(2.0 * H))

    def u(k, shape):
        return jax.random.uniform(k, shape, jnp.float32, -bound, bound)

    wq = u(ks[0], (2 * H, H)); bq = u(ks[1], (H,))
    wk = u(ks[2], (2 * H, H)); bk = u(ks[3], (H,))
    wv = u(ks[4], (2 * H, H)); bv = u(ks[5], (H,))
    wg = u(ks[6], (2 * H, 1)); bg = u(ks[7], (1,))

    sem = jax.random.normal(ks[8], (B, S, H), jnp.float32)
    temp = jax.random.normal(ks[9], (B, S, H), jnp.float32)

    params = (wq, bq, wk, bk, wv, bv, wg, bg)
    fused, attn_mean = gated_spatio_temp_attention(sem, temp, params)
    jax.block_until_ready((fused, attn_mean))

    # Pure-JAX float32 reference (module semantics).
    combined = jnp.concatenate([sem, temp], axis=-1)
    Q = combined @ wq + bq
    K = combined @ wk + bk
    V = combined @ wv + bv
    scores = jax.nn.softmax(
        jnp.einsum("bqh,bkh->bqk", Q, K) / jnp.sqrt(jnp.float32(H)), axis=-1)
    gate = jax.nn.sigmoid(combined @ wg + bg)
    aw = scores * gate
    ref_fused = jnp.einsum("bqk,bkh->bqh", aw, V) + sem
    ref_mean = aw.mean(axis=1)

    # Tolerances account for bf16 MXU operands (f32 accumulation) in the kernel.
    assert jnp.allclose(fused, ref_fused, atol=2e-2, rtol=2e-2), "fused mismatch"
    assert jnp.allclose(attn_mean, ref_mean, atol=2e-2, rtol=2e-2), "attn_mean mismatch"
    print("KERNEL_OK")
</pallas_src>

<mosaic_0001>
module attributes {stable_mosaic.version = 11 : i64} {
  func.func @_gated_attn_kernel(%arg0: i32, %arg1: memref<1x8x32xf32, #tpu.memory_space<vmem>>, %arg2: memref<1x8x32xf32, #tpu.memory_space<vmem>>, %arg3: memref<32x128xbf16, #tpu.memory_space<vmem>>, %arg4: memref<32x128xbf16, #tpu.memory_space<vmem>>, %arg5: memref<1x128xf32, #tpu.memory_space<vmem>>, %arg6: memref<1x1x256xf32, #tpu.memory_space<vmem>>, %arg7: memref<1x1x8xf32, #tpu.memory_space<vmem>>) attributes {dimension_semantics = [#tpu.dimension_semantics<parallel>], iteration_bounds = array<i64: 2>, scalar_prefetch = 0 : i64, scratch_operands = 0 : i64, tpu.core_type = #tpu.core_type<tc>, window_params = [{transform_indices = @transform_0, window_bounds = array<i64: 1, 8, 32>}, {transform_indices = @transform_1, window_bounds = array<i64: 1, 8, 32>}, {pipeline_mode = #tpu.pipeline_mode<synchronous>, transform_indices = @transform_2, window_bounds = array<i64: 32, 128>}, {pipeline_mode = #tpu.pipeline_mode<synchronous>, transform_indices = @transform_3, window_bounds = array<i64: 32, 128>}, {pipeline_mode = #tpu.pipeline_mode<synchronous>, transform_indices = @transform_4, window_bounds = array<i64: 1, 128>}, {transform_indices = @transform_5, window_bounds = array<i64: 1, 1, 256>}, {transform_indices = @transform_6, window_bounds = array<i64: 1, 1, 8>}]} {
    %c0 = arith.constant 0 : index
    %c0_0 = arith.constant 0 : index
    %c0_1 = arith.constant 0 : index
    %0 = vector.load %arg1[%c0, %c0_0, %c0_1] : memref<1x8x32xf32, #tpu.memory_space<vmem>>, vector<1x8x32xf32>
    %1 = vector.shape_cast %0 : vector<1x8x32xf32> to vector<8x32xf32>
    %2 = arith.truncf %1 : vector<8x32xf32> to vector<8x32xbf16>
    %c0_2 = arith.constant 0 : index
    %c0_3 = arith.constant 0 : index
    %c0_4 = arith.constant 0 : index
    %3 = vector.load %arg2[%c0_2, %c0_3, %c0_4] : memref<1x8x32xf32, #tpu.memory_space<vmem>>, vector<1x8x32xf32>
    %4 = vector.shape_cast %3 : vector<1x8x32xf32> to vector<8x32xf32>
    %5 = arith.truncf %4 : vector<8x32xf32> to vector<8x32xbf16>
    %c0_5 = arith.constant 0 : index
    %c0_6 = arith.constant 0 : index
    %6 = vector.load %arg3[%c0_5, %c0_6] : memref<32x128xbf16, #tpu.memory_space<vmem>>, vector<32x128xbf16>
    %cst = arith.constant dense<0.000000e+00> : vector<8x128xf32>
    %7 = tpu.matmul %2, %6, %cst {dimension_numbers = #tpu.dot_dimension_numbers<[1], [0], [0], [1], [0, 0, 1, 1], [], []>} : vector<8x32xbf16>, vector<32x128xbf16>, vector<8x128xf32> -> vector<8x128xf32>
    %c0_7 = arith.constant 0 : index
    %c0_8 = arith.constant 0 : index
    %8 = vector.load %arg4[%c0_7, %c0_8] : memref<32x128xbf16, #tpu.memory_space<vmem>>, vector<32x128xbf16>
    %cst_9 = arith.constant dense<0.000000e+00> : vector<8x128xf32>
    %9 = tpu.matmul %5, %8, %cst_9 {dimension_numbers = #tpu.dot_dimension_numbers<[1], [0], [0], [1], [0, 0, 1, 1], [], []>} : vector<8x32xbf16>, vector<32x128xbf16>, vector<8x128xf32> -> vector<8x128xf32>
    %10 = arith.addf %7, %9 : vector<8x128xf32>
    %c0_10 = arith.constant 0 : index
    %c0_11 = arith.constant 0 : index
    %11 = vector.load %arg5[%c0_10, %c0_11] : memref<1x128xf32, #tpu.memory_space<vmem>>, vector<1x128xf32>
    %12 = vector.broadcast %11 : vector<1x128xf32> to vector<8x128xf32>
    %13 = arith.addf %10, %12 : vector<8x128xf32>
    %14 = vector.extract_strided_slice %13 {offsets = [0, 0], sizes = [8, 32], strides = [1, 1]} : vector<8x128xf32> to vector<8x32xf32>
    %15 = vector.shape_cast %14 : vector<8x32xf32> to vector<1x8x32xf32>
    %16 = arith.truncf %15 : vector<1x8x32xf32> to vector<1x8x32xbf16>
    %17 = vector.extract_strided_slice %13 {offsets = [0, 32], sizes = [8, 32], strides = [1, 1]} : vector<8x128xf32> to vector<8x32xf32>
    %18 = vector.shape_cast %17 : vector<8x32xf32> to vector<1x8x32xf32>
    %19 = arith.truncf %18 : vector<1x8x32xf32> to vector<1x8x32xbf16>
    %20 = vector.extract_strided_slice %13 {offsets = [0, 64], sizes = [8, 32], strides = [1, 1]} : vector<8x128xf32> to vector<8x32xf32>
    %21 = vector.shape_cast %20 : vector<8x32xf32> to vector<1x8x32xf32>
    %22 = arith.truncf %21 : vector<1x8x32xf32> to vector<1x8x32xbf16>
    %23 = vector.extract_strided_slice %13 {offsets = [0, 96], sizes = [8, 1], strides = [1, 1]} : vector<8x128xf32> to vector<8x1xf32>
    %24 = vector.shape_cast %23 : vector<8x1xf32> to vector<1x8x1xf32>
    "tpu.trace_start"() <{level = 10 : i32, message = "bqc,bkc->bqk"}> : () -> ()
    %cst_12 = arith.constant dense<0.000000e+00> : vector<1x8x8xf32>
    %25 = tpu.matmul %16, %19, %cst_12 {dimension_numbers = #tpu.dot_dimension_numbers<[2], [2], [1], [1], [0, 0, 0, 1, 1, 1], [0], [0]>} : vector<1x8x32xbf16>, vector<1x8x32xbf16>, vector<1x8x8xf32> -> vector<1x8x8xf32>
    "tpu.trace_stop"() : () -> ()
    %cst_13 = arith.constant dense<0xFF800000> : vector<1x8xf32>
    %26 = vector.multi_reduction <maximumf>, %25, %cst_13 [2] : vector<1x8x8xf32> to vector<1x8xf32>
    %27 = vector.shape_cast %26 : vector<1x8xf32> to vector<1x8x1xf32>
    %28 = vector.broadcast %27 : vector<1x8x1xf32> to vector<1x8x8xf32>
    %29 = arith.subf %25, %28 : vector<1x8x8xf32>
    %30 = math.exp %29 : vector<1x8x8xf32>
    %cst_14 = arith.constant dense<0.000000e+00> : vector<1x8xf32>
    %31 = vector.multi_reduction <add>, %30, %cst_14 [2] : vector<1x8x8xf32> to vector<1x8xf32>
    %32 = vector.shape_cast %31 : vector<1x8xf32> to vector<1x8x1xf32>
    %33 = arith.negf %24 : vector<1x8x1xf32>
    %34 = math.exp %33 : vector<1x8x1xf32>
    %cst_15 = arith.constant 1.000000e+00 : f32
    %35 = vector.broadcast %cst_15 : f32 to vector<1x8x1xf32>
    %36 = arith.addf %35, %34 : vector<1x8x1xf32>
    %37 = arith.divf %35, %36 : vector<1x8x1xf32>
    %38 = arith.divf %37, %32 : vector<1x8x1xf32>
    %39 = arith.truncf %30 : vector<1x8x8xf32> to vector<1x8x8xbf16>
    "tpu.trace_start"() <{level = 10 : i32, message = "bqk,bkc->bqc"}> : () -> ()
    %cst_16 = arith.constant dense<0.000000e+00> : vector<1x8x32xf32>
    %40 = tpu.matmul %39, %22, %cst_16 {dimension_numbers = #tpu.dot_dimension_numbers<[2], [1], [1], [2], [0, 0, 0, 1, 1, 2], [0], [0]>} : vector<1x8x8xbf16>, vector<1x8x32xbf16>, vector<1x8x32xf32> -> vector<1x8x32xf32>
    "tpu.trace_stop"() : () -> ()
    %41 = vector.broadcast %38 : vector<1x8x1xf32> to vector<1x8x32xf32>
    %42 = arith.mulf %40, %41 : vector<1x8x32xf32>
    %43 = arith.addf %42, %0 : vector<1x8x32xf32>
    %44 = vector.shape_cast %43 : vector<1x8x32xf32> to vector<1x1x256xf32>
    %c0_17 = arith.constant 0 : index
    %c0_18 = arith.constant 0 : index
    %c0_19 = arith.constant 0 : index
    %45 = vector.load %arg6[%c0_17, %c0_18, %c0_19] : memref<1x1x256xf32, #tpu.memory_space<vmem>>, vector<1x1x256xf32>
    tpu.vector_store %arg6[%c0_17, %c0_18, %c0_19], %44 {strides = array<i32>} : memref<1x1x256xf32, #tpu.memory_space<vmem>>, vector<1x1x256xf32>,
    %46 = vector.shape_cast %38 : vector<1x8x1xf32> to vector<1x1x8xf32>
    "tpu.trace_start"() <{level = 10 : i32, message = "bxq,bqk->bxk"}> : () -> ()
    %cst_20 = arith.constant dense<0.000000e+00> : vector<1x1x8xf32>
    %47 = tpu.matmul %46, %30, %cst_20 {dimension_numbers = #tpu.dot_dimension_numbers<[2], [1], [1], [2], [0, 0, 0, 1, 1, 2], [0], [0]>} : vector<1x1x8xf32>, vector<1x8x8xf32>, vector<1x1x8xf32> -> vector<1x1x8xf32>
    "tpu.trace_stop"() : () -> ()
    %cst_21 = arith.constant 1.250000e-01 : f32
    %48 = vector.broadcast %cst_21 : f32 to vector<1x1x8xf32>
    %49 = arith.mulf %47, %48 : vector<1x1x8xf32>
    %c0_22 = arith.constant 0 : index
    %c0_23 = arith.constant 0 : index
    %c0_24 = arith.constant 0 : index
    %50 = vector.load %arg7[%c0_22, %c0_23, %c0_24] : memref<1x1x8xf32, #tpu.memory_space<vmem>>, vector<1x1x8xf32>
    tpu.vector_store %arg7[%c0_22, %c0_23, %c0_24], %49 {strides = array<i32>} : memref<1x1x8xf32, #tpu.memory_space<vmem>>, vector<1x1x8xf32>,
    return
  }
  func.func @transform_0(%arg0: i32) -> (i32, i32, i32) {
    %c0_i32 = arith.constant 0 : i32
    %c0_i32_0 = arith.constant 0 : i32
    %c0_i32_1 = arith.constant 0 : i32
    return %arg0, %c0_i32, %c0_i32_0 : i32, i32, i32
  }
  func.func @transform_1(%arg0: i32) -> (i32, i32, i32) {
    %c0_i32 = arith.constant 0 : i32
    %c0_i32_0 = arith.constant 0 : i32
    %c0_i32_1 = arith.constant 0 : i32
    return %arg0, %c0_i32, %c0_i32_0 : i32, i32, i32
  }
  func.func @transform_2(%arg0: i32) -> (i32, i32) {
    %c0_i32 = arith.constant 0 : i32
    %c0_i32_0 = arith.constant 0 : i32
    %c0_i32_1 = arith.constant 0 : i32
    return %c0_i32, %c0_i32_0 : i32, i32
  }
  func.func @transform_3(%arg0: i32) -> (i32, i32) {
    %c0_i32 = arith.constant 0 : i32
    %c0_i32_0 = arith.constant 0 : i32
    %c0_i32_1 = arith.constant 0 : i32
    return %c0_i32, %c0_i32_0 : i32, i32
  }
  func.func @transform_4(%arg0: i32) -> (i32, i32) {
    %c0_i32 = arith.constant 0 : i32
    %c0_i32_0 = arith.constant 0 : i32
    %c0_i32_1 = arith.constant 0 : i32
    return %c0_i32, %c0_i32_0 : i32, i32
  }
  func.func @transform_5(%arg0: i32) -> (i32, i32, i32) {
    %c0_i32 = arith.constant 0 : i32
    %c0_i32_0 = arith.constant 0 : i32
    %c0_i32_1 = arith.constant 0 : i32
    return %arg0, %c0_i32, %c0_i32_0 : i32, i32, i32
  }
  func.func @transform_6(%arg0: i32) -> (i32, i32, i32) {
    %c0_i32 = arith.constant 0 : i32
    %c0_i32_0 = arith.constant 0 : i32
    %c0_i32_1 = arith.constant 0 : i32
    return %arg0, %c0_i32, %c0_i32_0 : i32, i32, i32
  }
}

</mosaic_0001>

<bundles_post_ra>
// kernel: tpu_custom_call.1
= control target key start
LH: loop header
LB: loop body
LE: loop exit
PB: predicated region body
PF: predicated region fallthrough
CT: control target
= control target key end

     0   :  { %s1785_s0 = inlined_call_operand.hbm [shape: f32[2,8,32], index: 0, kind: input, shape index: {}]   ;;  %s1786_s1 = inlined_call_operand.hbm [shape: f32[2,8,32], index: 1, kind: input, shape index: {}]   ;;  %s1787_s2 = inlined_call_operand.hbm [shape: bf16[32,128], index: 2, kind: input, shape index: {}]   ;;  %s1788_s3 = inlined_call_operand.hbm [shape: bf16[32,128], index: 3, kind: input, shape index: {}]   ;;  %s1789_s4 = inlined_call_operand.vmem [shape: f32[1,128], index: 4, kind: input, shape index: {}]   ;;  %s1790_s5 = inlined_call_operand.hbm [shape: f32[2,1,256], index: 5, kind: output, shape index: {0}]   ;;  %s1791_s6 = inlined_call_operand.hbm [shape: f32[2,1,8], index: 6, kind: output, shape index: {1}]  }
   0x1   :  { %1796 = sst [smem:[#allocation20_spill]] %s1787_s2 }
   0x2   :  { %1797 = sst [smem:[#allocation21_spill]] %s1788_s3 }
   0x3   :  { %12 = vsyncpa [#allocation3], 0 }
   0x4   :  { %14 = vsyncpa [#allocation3 + $0x1], 0 }
   0x5   :  { %15 = vsyncpa [#allocation6], 0 }
   0x6   :  { %17 = vsyncpa [#allocation6 + $0x1], 0 }
   0x7   :  { %18 = vsyncpa [#allocation9], 0 }
   0x8   :  { %19 = vsyncpa [#allocation4], 0 }
   0x9   :  { %21 = vsyncpa [#allocation4 + $0x1], 0 }
   0xa   :  { %22 = vsyncpa [#allocation12], 0 }
   0xb   :  { %24 = vsyncpa [#allocation12 + $0x1], 0  ;;  %s1417_s21 = smov 0   ;;  %s1419_s22 = smov 0  }
   0xc   :  { %s1421_s23 = smov 0   ;;  %s1423_s24 = smov 0  }
   0xd LB: > { %s1438_s25 = sadd.s32 4294967295, %s1363_s24   ;;  %s957_s26 = sadd.s32 4294967294, %s1363_s24   ;;  %s1363_s24 = sphi %s1423_s24, %s1821_s24   ;;  %s1359_s23 = sphi %s1421_s23, %s1820_s23   ;;  %s1355_s22 = sphi %s1419_s22, %s1819_s22   ;;  %s1351_s21 = sphi %s1417_s21, %s1818_s21  }
   0xe   : > { %p50_p0 = scmp.ne.s32.totalorder %s1355_s22, %s1351_s21  ;;  %p1792_p1 = scmp.eq.s32.totalorder %s1438_s25, 0 }
   0xf   : > { %p169_p3 = scmp.eq.s32.totalorder %s957_s26, 1  ;;  %p958_p5 = scmp.ge.s32.totalorder %s1363_s24, 1 }
  0x10   : > { %p1447_p4 = por %p1792_p1, %p50_p0  ;;  %p202_p7 = scmp.lt.s32.totalorder %s1363_s24, 3 }
  0x11   : > { %p1452_p6 = por %p169_p3, %p50_p0  ;;  %s1365_s30 = smov [#allocation7]  }
  0x12   : > { %s1798_s27 = scalar_select %p1447_p4, 1, 0 }
  0x13   : > { %s1799_s28 = scalar_select %p1452_p6, 1, 0 }
  0x14   : > { %p1457_p8 = pnand %p958_p5, %p202_p7  ;;  %s214_s7 = sshll.u32 %s1365_s30, 4  ;;  %s1461_s7 = int_to_ptr.vmem [resolvable:$true] %s214_s7 }
  0x15   : > { %s1366_s9 = smov [#allocation8]   ;;  %s1802_s2 = sld [smem:[#allocation20_spill]] }
  0x16   : > { %s1800_s29 = scalar_select %p1457_p8, 1, 0 }
  0x17   : > { %p1051_p9 = pneg %p1457_p8  ;;  %s227_s10 = sshll.u32 %s1366_s9, 4  ;;  %s1472_s10 = int_to_ptr.vmem [resolvable:$true] %s227_s10 }
  0x19   : > { %p1468_p11 = pnand %p1051_p9, %p1792_p1 }
  0x1b   : > { %s1137_s13 = scalar_lea.hbm %s1802_s2, 256  ;;  %p1139_p13 = pneg %p1468_p11 }
  0x1c   : > { %p1138_p12 = scmp.ne.s32.totalorder %s1802_s2, %s1137_s13  ;;  %p1144_p5 = scmp.lt.u32.totalorder %s1137_s13, %s1802_s2 }
  0x1e   : > { %p1140_p0 = pnand %p1139_p13, %p1138_p12 }
  0x20   : > { %p1141_p3 = pneg %p1140_p0 }
  0x22   : > { %p1146_p7 = pnand %p1144_p5, %p1141_p3 }
  0x24   : > { %1149 = shalt.err (!%p1146_p7)
}
  0x25   : > { %s1150_s18 = scalar_lea.vmem %s1461_s7, 256  ;;  %p1158_p2 = scmp.lt.s32.totalorder %s1461_s7, %s1461_s7 }
  0x26   : > { %p1151_p9 = scmp.ne.s32.totalorder %s1461_s7, %s1150_s18  ;;  %p1159_p12 = scmp.lt.s32.totalorder %s1150_s18, %s1150_s18 }
  0x28   : > { %p1153_p10 = pnand %p1151_p9, %p1139_p13  ;;  %p1160_p0 = por %p1159_p12, %p1158_p2 }
  0x2a   : > { %p1154_p1 = pneg %p1153_p10 }
  0x2c   : > { %p1161_p6 = pnand %p1160_p0, %p1154_p1 }
  0x2e   : > { %1164 = shalt.err (!%p1161_p6)
}
  0x2f   : > { %s1367_s19 = smov 64   ;;  %s1368_s20 = smov 4  }
  0x30   : > { %1054 = dma.hbm_to_vmem [thread:$0]  (!%p1468_p11), %s1802_s2, 256, %s1461_s7, [#allocation6], %s1367_s19, %s1367_s19, %s1368_s20  }
  0x31   : > { %s1803_s3 = sld [smem:[#allocation21_spill]] }
  0x37   : > { %s1165_s12 = scalar_lea.hbm %s1803_s3, 256 }
  0x38   : > { %p1166_p2 = scmp.ne.s32.totalorder %s1803_s3, %s1165_s12  ;;  %p1172_p10 = scmp.lt.u32.totalorder %s1165_s12, %s1803_s3 }
  0x3a   : > { %p1168_p1 = pnand %p1166_p2, %p1139_p13 }
  0x3c   : > { %p1169_p6 = pneg %p1168_p1 }
  0x3e   : > { %p1174_p3 = pnand %p1172_p10, %p1169_p6 }
  0x40   : > { %1177 = shalt.err (!%p1174_p3)
}
  0x41   : > { %s1178_s7 = scalar_lea.vmem %s1472_s10, 256  ;;  %p1186_p12 = scmp.lt.s32.totalorder %s1472_s10, %s1472_s10 }
  0x42   : > { %p1179_p5 = scmp.ne.s32.totalorder %s1472_s10, %s1178_s7  ;;  %p1187_p0 = scmp.lt.s32.totalorder %s1178_s7, %s1178_s7 }
  0x44   : > { %p1181_p7 = pnand %p1179_p5, %p1139_p13  ;;  %p1188_p2 = por %p1187_p0, %p1186_p12 }
  0x46   : > { %p1182_p9 = pneg %p1181_p7 }
  0x48   : > { %p1189_p1 = pnand %p1188_p2, %p1182_p9 }
  0x4a   : > { %1192 = shalt.err (!%p1189_p1)
}
  0x4b   : > { %1057 = dma.hbm_to_vmem [thread:$0]  (!%p1468_p11), %s1803_s3, 256, %s1472_s10, [#allocation9], %s1367_s19, %s1367_s19, %s1368_s20  }
  0x4c   : > { %s1527_s26 = sadd.s32 1, %s1363_s24   ;;  %s37_s8 = sadd.s32 1, %s1359_s23 }
  0x4d   : > { %s34_s30 = ssub.s32 %s1363_s24, %s1527_s26  ;;  %p44_p13 = scmp.ne.s32.totalorder %s1359_s23, %s1355_s22 }
  0x4e   : > { %p35_p6 = scmp.eq.s32.totalorder %s34_s30, 0  ;;  %p45_p10 = scmp.eq.s32.totalorder %s1363_s24, 0 }
  0x4f   : > { %p1804_p3 = scmp.eq.s32.totalorder %s1438_s25, 1  ;;  %p1074_p7 = scmp.lt.s32.totalorder %s1363_s24, 2 }
  0x50   : > { %s1543_s11 = scalar_select %p35_p6, %s1359_s23, %s37_s8  }
  0x51   : > { %p1537_p5 = por %p1804_p3, %p44_p13  ;;  %p46_p9 = por %p45_p10, %p44_p13 }
  0x52   : > { %1806 = sst [smem:[#allocation19_spill]] %s1543_s11  ;;  %s244_s12 = sand.u32 1, %s1359_s23  }
  0x53   : > { %s1805_s9 = scalar_select %p1537_p5, 1, 0 }
  0x54   : > { %s1546_s10 = sshll.u32 %s244_s12, 3  ;;  %s963_s19 = sshll.u32 %s1363_s24, 7 }
  0x55   : > { %s1552_s14 = scalar_lea.hbm %s1785_s0, %s963_s19  ;;  %s248_s15 = scalar_lea.vmem [#allocation2], %s1546_s10 }
  0x56   : > { %s255_s16 = sshll.u32 %s248_s15, 4  ;;  %p1557_p11 = pnand %p1074_p7, %p46_p9  ;;  %s1555_s16 = int_to_ptr.vmem [resolvable:$true] %s255_s16 }
  0x57   : > { %s1564_s8 = scalar_lea.hbm %s1786_s1, %s963_s19  ;;  %s262_s30 = sand.u32 1, %s1363_s24  }
  0x58   : > { %s245_s20 = scalar_lea.sflag [#allocation3], %s244_s12  ;;  %s1193_s13 = scalar_lea.hbm %s1552_s14, 128 }
  0x59   : > { %p1194_p12 = scmp.ne.s32.totalorder %s1552_s14, %s1193_s13  ;;  %p1195_p0 = pneg %p1557_p11 }
  0x5a   : > { %s1198_s3 = scalar_lea.hbm %s1785_s0, 256  ;;  %p1199_p13 = scmp.lt.u32.totalorder %s1552_s14, %s1785_s0 }
  0x5b   : > { %p1196_p2 = pnand %p1195_p0, %p1194_p12  ;;  %p1200_p6 = scmp.lt.u32.totalorder %s1198_s3, %s1193_s13 }
  0x5c   : > { %p1202_p3 = scmp.lt.u32.totalorder %s1193_s13, %s1552_s14 }
  0x5d   : > { %p1197_p1 = pneg %p1196_p2  ;;  %p1201_p10 = por %p1200_p6, %p1199_p13 }
  0x5f   : > { %p1203_p7 = por %p1202_p3, %p1201_p10 }
  0x61   : > { %p1204_p9 = pnand %p1203_p7, %p1197_p1 }
  0x63   : > { %1207 = shalt.err (!%p1204_p9)
}
  0x64   : > { %s1208_s12 = scalar_lea.vmem %s1555_s16, 128  ;;  %s1369_s2 = smov [#allocation2]  }
  0x65   : > { %p1209_p12 = scmp.ne.s32.totalorder %s1555_s16, %s1208_s12  ;;  %s1213_s19 = sshll.u32 %s1369_s2, 4  ;;  %s1214_s19 = int_to_ptr.vmem [resolvable:$false] %s1213_s19 }
  0x66   : > { %s1215_s11 = scalar_lea.vmem %s1214_s19, 256  ;;  %p1216_p4 = scmp.lt.s32.totalorder %s1555_s16, %s1214_s19 }
  0x67   : > { %p1211_p2 = pnand %p1209_p12, %p1195_p0  ;;  %p1217_p13 = scmp.lt.s32.totalorder %s1215_s11, %s1208_s12 }
  0x69   : > { %p1212_p5 = pneg %p1211_p2  ;;  %p1218_p6 = por %p1217_p13, %p1216_p4 }
  0x6b   : > { %p1219_p10 = pnand %p1218_p6, %p1212_p5 }
  0x6d   : > { %1222 = shalt.err (!%p1219_p10)
}
  0x6e   : > { %1061 = dma.hbm_to_vmem [thread:$0]  (!%p1557_p11), %s1552_s14, 128, %s1555_s16, %s245_s20  }
  0x6f   : > { %s266_s3 = scalar_lea.vmem [#allocation5], %s1546_s10  ;;  %s263_s13 = scalar_lea.sflag [#allocation6], %s262_s30 }
  0x70   : > { %s273_s18 = sshll.u32 %s266_s3, 4  ;;  %s1223_s15 = scalar_lea.hbm %s1564_s8, 128  ;;  %s274_s18 = int_to_ptr.vmem [resolvable:$true] %s273_s18 }
  0x71   : > { %p1224_p4 = scmp.ne.s32.totalorder %s1564_s8, %s1223_s15  ;;  %s1228_s2 = scalar_lea.hbm %s1786_s1, 256 }
  0x72   : > { %p1229_p3 = scmp.lt.u32.totalorder %s1564_s8, %s1786_s1  ;;  %p1230_p7 = scmp.lt.u32.totalorder %s1228_s2, %s1223_s15 }
  0x73   : > { %p1226_p5 = pnand %p1224_p4, %p1195_p0  ;;  %p1232_p12 = scmp.lt.u32.totalorder %s1223_s15, %s1564_s8 }
  0x74   : > { %p1231_p9 = por %p1230_p7, %p1229_p3 }
  0x75   : > { %p1227_p1 = pneg %p1226_p5 }
  0x76   : > { %p1233_p2 = por %p1232_p12, %p1231_p9 }
  0x78   : > { %p1234_p13 = pnand %p1233_p2, %p1227_p1 }
  0x7a   : > { %1237 = shalt.err (!%p1234_p13)
}
  0x7b   : > { %s1238_s10 = scalar_lea.vmem %s274_s18, 128  ;;  %s1370_s14 = smov [#allocation5]  }
  0x7c   : > { %p1239_p6 = scmp.ne.s32.totalorder %s274_s18, %s1238_s10  ;;  %s1243_s16 = sshll.u32 %s1370_s14, 4  ;;  %s1244_s16 = int_to_ptr.vmem [resolvable:$false] %s1243_s16 }
  0x7d   : > { %s1245_s30 = scalar_lea.vmem %s1244_s16, 256  ;;  %p1246_p5 = scmp.lt.s32.totalorder %s274_s18, %s1244_s16 }
  0x7e   : > { %p1241_p10 = pnand %p1239_p6, %p1195_p0  ;;  %p1247_p8 = scmp.lt.s32.totalorder %s1245_s30, %s1238_s10 }
  0x80   : > { %p1242_p4 = pneg %p1241_p10  ;;  %p1248_p3 = por %p1247_p8, %p1246_p5 }
  0x82   : > { %p1249_p7 = pnand %p1248_p3, %p1242_p4 }
  0x84   : > { %1252 = shalt.err (!%p1249_p7)
}
  0x85   : > { %1064 = dma.hbm_to_vmem [thread:$0]  (!%p1557_p11), %s1564_s8, 128, %s274_s18, %s263_s13  }
  0x86   : > { %p1808_p1 = scmp.ne.s32.totalorder %s1800_s29, 0 }
  0x87   : > { %s1617_s20 = sand.u32 (!%p1808_p1), 1, %s1355_s22   ;;  %p1809_p0 = scmp.ne.s32.totalorder (!%p1808_p1), %s1798_s27, 0 }
  0x88   : > { %282 = sbr.rel (%p1808_p1) target bundleno = 1413 (0x585), region = 40  ;;  %s967_s3 = sshll.u32 (!%p1808_p1), %s1617_s20, 3 }
  0x89   : > { %s285_s15 = scalar_lea.sflag (!%p1808_p1), [#allocation3], %s1617_s20  ;;  %s288_s17 = scalar_lea.vmem (!%p1808_p1), [#allocation2], %s967_s3 }
  0x8f   : > { %1326 = dma.done.wait (%p1809_p0), %s285_s15, 128  }
  0x90   : > { %1328 = vsyncadd (%p1809_p0), %s285_s15, 4294967168  ;;  %s293_s7 = sand.u32 1, %s1438_s25   ;;  %s297_s29 = scalar_lea.vmem [#allocation5], %s967_s3 }
  0x91   : > { %s294_s8 = scalar_lea.sflag [#allocation6], %s293_s7 }
  0x92   : > { %1330 = dma.done.wait (%p1809_p0), %s294_s8, 128  }
  0x93   : > { %1332 = vsyncadd (%p1809_p0), %s294_s8, 4294967168  ;;  %p1810_p8 = scmp.eq.s32.totalorder %s1438_s25, 0 }
  0x95   : > { %1334 = dma.done.wait (%p1810_p8), [#allocation6], 256   ;;  %p1811_p11 = pmov %p1810_p8 }
  0x96   : > { %p1812_p9 = pmov %p1810_p8 }
  0x97   : > { %1336 = vsyncadd (%p1811_p11), [#allocation6], 4294967040 }
  0x98   : > { %1338 = dma.done.wait (%p1812_p9), [#allocation9], 256   ;;  %p1813_p12 = pmov %p1810_p8 }
  0x99   : > { %v1371_v0 = vmov 0.0   ;;  %vm1372_vm0 = vmmov 0   ;;  %v1125_v1 = vld [vmem:[#allocation8] sm:$0xff]   ;;  %v1126_v2 = vld [vmem:[#allocation7] sm:$0xff]   ;;  %v1127_v3 = vld [vmem:[#allocation8 + $0x8] sm:$0xff]   ;;  %vm368_vm1 = vcmask 261120   ;;  %v604_v44 = vlaneseq }
  0x9a   : > { %1340 = vsyncadd (%p1813_p12), [#allocation9], 4294967040  ;;  %1002 = vmatprep.subr.bf16.mxu0 %v1371_v0  ;;  %1010 = vmatprep.subr.bf16.mxu1 %v1371_v0  ;;  %v1128_v4 = vld [vmem:[#allocation7 + $0x8] sm:$0xff]   ;;  %v346_v5 = vld [vmem:[%s297_s29] sm:$0xff]  ;;  %s1373_s13 = smov 96   ;;  %vm525_vm2 = vcmask 64512  }
  0x9b   : > { %1006 = vmatprep.mubr.msk.bf16.mxu0 %vm1372_vm0, %v1371_v0  ;;  %1014 = vmatprep.mubr.msk.bf16.mxu1 %vm1372_vm0, %v1371_v0  ;;  %v1646_v6 = vld [vmem:[%s288_s17] sm:$0xff]  ;;  %v347_v7 = vpack.c.bf16 %v346_v5, %v346_v5  ;;  %s1374_s12 = smov 64   ;;  %v1375_v33 = vmov 96   ;;  %vm549_vm3 = vcmask 1043456   ;;  %v1672_v45 = vshrl.u32 %v604_v44, 7  ;;  %s1378_s2 = smov 32  }
  0x9c   : > { %1003 = vmatpush3.bf16.msra.mxu0 %v1125_v1  ;;  %1011 = vmatpush3.bf16.msra.mxu1 %v1126_v2  ;;  %v345_v8 = vpack.c.bf16 %v1646_v6, %v1646_v6  ;;  %v978_v11 = vld [vmem:[%s1789_s4] ss:$0 sm:$0xff]  ;;  %v705_v46 = vand.u32 127, %v604_v44  ;;  %v1376_v50 = vmov 1983009808   ;;  %s986_s19 = sshll.u32 %s1438_s25, 4 }
  0x9d   : > { %1004 = vmatprep.subr.bf16.mxu0 %v1371_v0  ;;  %1012 = vmatprep.subr.bf16.mxu1 %v1371_v0  ;;  %v602_v51 = vunpack.c.l.s4 %v1376_v50  ;;  %v1377_v52 = vmov 1934713408   ;;  %s342_s11 = scalar_lea.vmem [#allocation11], %s1617_s20  ;;  %vm783_vm4 = vcmask 57344   ;;  %s1699_s30 = scalar_lea.hbm %s1791_s6, %s986_s19  ;;  %vm674_vm5 = vcmask 523264  }
  0x9e   : > { %1123 = vset.pattern.permute.xlu1 %v1375_v33  ;;  %1124 = vset.pattern.permute.xlu0 %v1375_v33  ;;  %v708_v47 = vsub.s32 %v705_v46, %v1672_v45  ;;  %v617_v53 = vunpack.c.l.s4 %v1377_v52  ;;  %s817_s10 = sshll.u32 %s342_s11, 4  ;;  %s971_s3 = sshll.u32 %s1617_s20, 1  ;;  %vm676_vm6 = vcmask 785408   ;;  %s1701_s10 = int_to_ptr.vmem [resolvable:$true] %s817_s10 }
  0x9f   : > { %v603_v54 = vunpack.c.0.s8 %v602_v51  ;;  %s791_s15 = scalar_lea.sflag [#allocation12], %s1617_s20  ;;  %s1253_s17 = scalar_lea.vmem %s1701_s10, 16 }
  0xa0   : > { %1005 = vmatpush3.bf16.msra.mxu0 %v1127_v3  ;;  %1013 = vmatpush3.bf16.msra.mxu1 %v1128_v4  ;;  %v618_v55 = vunpack.c.0.s8 %v617_v53  ;;  %p1254_p2 = scmp.ne.s32.totalorder %s1701_s10, %s1253_s17  ;;  %p1814_p13 = scmp.ne.s32.totalorder %s1805_s9, 0 }
  0xa1   : > { %1018 = vmatprep.subr.bf16.mxu0 %v1371_v0  ;;  %1024 = vmatprep.subr.bf16.mxu1 %v1371_v0  ;;  %v606_v58 = vsub.s32 %v603_v54, %v1672_v45  ;;  %s1380_s7 = smov [#allocation11]  }
  0xa2   : > { %v621_v63 = vsub.s32 %v618_v55, %v1672_v45  ;;  %p1255_p6 = pnand %p1254_p2, %p1814_p13  ;;  %s1257_s8 = sshll.u32 %s1380_s7, 4  ;;  %s1258_s8 = int_to_ptr.vmem [resolvable:$false] %s1257_s8 }
  0xa3   : > { %1007 = vmatmul.mubr.msk.bf16.vlgmr.msra.gmra.mrb[0].mxu0 %vm368_vm1, %v347_v7  ;;  %1015 = vmatmul.mubr.msk.bf16.vlgmr.msra.gmra.mrb[0].mxu1 %vm368_vm1, %v345_v8  ;;  %s1259_s29 = scalar_lea.vmem %s1258_s8, 32  ;;  %p1260_p4 = scmp.lt.s32.totalorder %s1701_s10, %s1258_s8 }
  0xa4   : > { %1020 = vmatprep.mubr.msk.bf16.mxu0 %vm1372_vm0, %v1371_v0  ;;  %1026 = vmatprep.mubr.msk.bf16.mxu1 %vm1372_vm0, %v1371_v0  ;;  %p1256_p10 = pneg %p1255_p6  ;;  %p1261_p5 = scmp.lt.s32.totalorder %s1259_s29, %s1253_s17 }
  0xa6   : > { %p1262_p3 = por %p1261_p5, %p1260_p4 }
  0xa8   : > { %p1263_p7 = pnand %p1262_p3, %p1256_p10 }
 0x176   : > { %v406_v9 = vpop.f32.mrb[0].mxu0  ;;  %v461_v10 = vpop.f32.mrb[0].mxu1 }
 0x177   : > { %v1008_v12 = vpop.f32.mrb[1].mxu0  ;;  %v462_v13 = vadd.f32 %v461_v10, %v406_v9  ;;  %v1016_v14 = vpop.f32.mrb[1].mxu1 }
 0x178   : > { %v409_v15 = vpop.f32.mrb[2].mxu0  ;;  %v464_v16 = vpop.f32.mrb[2].mxu1 }
 0x179   : > { %v1009_v17 = vpop.f32.mrb[3].mxu0  ;;  %v474_v18 = vadd.f32 %v978_v11, %v462_v13  ;;  %v1017_v19 = vpop.f32.mrb[3].mxu1 }
 0x17a   : > { %v1379_v17 = vmov 1966171168  }
 0x17b   : > { %v475_v20 = vpack.c.bf16 %v474_v18, %v474_v18  ;;  %v980_v34 = vmul.f32 -1.442695, %v474_v18  ;;  %v685_v18 = vunpack.c.l.s4 %v1379_v17 }
 0x17d   : > { %477 = vrot.lane.b32.xlu0 %v475_v20, %s1373_s13 }
 0x1ef   : > { %v478_v21 = vpop.permute.xlu0 %477 }
 0x1f0   : > { %v483_v22 = vsel %vm368_vm1, %v478_v21, 0 }
 0x1f1   : > { %1019 = vmatpush3.bf16.xpose.msra.mxu0 %v483_v22  ;;  %v686_v22 = vunpack.c.0.s8 %v685_v18 }
 0x1f2   : > { %1030 = vmatprep.subr.mxu0 %v1371_v0 }
 0x1f8   : > { %1021 = vmatmul.mubr.msk.bf16.vlgmr.msra.gmra.mrb[4].mxu0 %vm368_vm1, %v475_v20 }
 0x1f9   : > { %1032 = vmatprep.mubr.msk.f32.mxu0 %vm1372_vm0, %v1371_v0 }
 0x2cb   : > { %v519_v23 = vpop.f32.mrb[4].mxu0 }
 0x2cc   : > { %v1022_v24 = vpop.f32.mrb[5].mxu0  ;;  %v526_v25 = vsel %vm525_vm2, %v519_v23, -inf }
 0x2cd   : > { %527 = vmax.xlane.f32.xlu0 %v526_v25  ;;  %v522_v26 = vpop.f32.mrb[6].mxu0 }
 0x2ce   : > { %v1023_v27 = vpop.f32.mrb[7].mxu0 }
 0x35a   : > { %v528_v28 = vpop.xlane.xlu0 %527 }
 0x35b   : > { %v529_v29 = vsub.f32 %v519_v23, %v528_v28 }
 0x35d   : > { %v530_v30 = vmul.f32 1.442695, %v529_v29 }
 0x35f   : > { %1129 = vpow2.f32 %v530_v30 }
 0x360   : > { %1131 = vpow2.f32 %v980_v34 }
 0x369   : > { %v1130_v31 = vpop.eup %1129 }
 0x36a   : > { %1031 = vmatpush3.msra.mxu0 %v1130_v31  ;;  %v532_v32 = vsel %vm525_vm2, %v1130_v31, 0.0  ;;  %v1132_v35 = vpop.eup %1131  ;;  %v543_v40 = vpack.c.bf16 %v1130_v31, %v1130_v31 }
 0x36b   : > { %533 = vadd.xlane.f32.xlu1 %v532_v32  ;;  %v538_v36 = vadd.f32 1.0, %v1132_v35 }
 0x36d   : > { %1133 = vrcp.f32 %v538_v36 }
 0x377   : > { %v1134_v41 = vpop.eup %1133 }
 0x37c   : > { %544 = vrot.lane.b32.xlu1 %v475_v20, %s1374_s12 }
 0x3f8   : > { %v534_v37 = vpop.xlane.xlu1 %533 }
 0x3f9   : > { %1135 = vrcp.f32 %v534_v37 }
 0x3fc   : > { %v545_v38 = vpop.permute.xlu1 %544 }
 0x3fd   : > { %v551_v39 = vsel %vm549_vm3, %v545_v38, 0 }
 0x3fe   : > { %1025 = vmatpush3.bf16.msra.mxu1 %v551_v39 }
 0x401   : > { %1027 = vmatmul.mubr.msk.bf16.vlgmr.msra.gmra.mrb[4].mxu1 %vm525_vm2, %v543_v40 }
 0x403   : > { %v1136_v42 = vpop.eup %1135 }
 0x404   : > { %v542_v43 = vmul.f32 %v1136_v42, %v1134_v41 }
 0x406   : > { %595 = vperm.xlu1 %1123, %v542_v43  }
 0x485   : > { %v596_v48 = vpop.permute.xlu1 %595 }
 0x486   : > { %v709_v49 = vrot.slane %v596_v48, %v708_v47 }
 0x488   : > { %1033 = vmatmul.mubr.msk.f32.vlgmr.msra.gmra.mrb[8].mxu0 %vm525_vm2, %v709_v49 }
 0x4d4   : > { %v587_v56 = vpop.f32.mrb[4].mxu1 }
 0x4d5   : > { %v598_v57 = vmul.f32 %v596_v48, %v587_v56  ;;  %v1028_v59 = vpop.f32.mrb[5].mxu1 }
 0x4d6   : > { %v590_v60 = vpop.f32.mrb[6].mxu1 }
 0x4d7   : > { %v599_v61 = vadd.f32 %v598_v57, %v1646_v6  ;;  %v1029_v62 = vpop.f32.mrb[7].mxu1 }
 0x4d9   : > { %v600_v1 = vcombine.high %v599_v61, %v1371_v0  ;;  %v607_v2 = vrot.slane %v599_v61, %v606_v58 }
 0x4db   : > { %v614_v3 = vrot.slane %v600_v1, %v606_v58  ;;  %v1681_v4 = vrot.slane %v607_v2, %v621_v63  ;;  %v615_v8 = vcombine.high %v607_v2, %v1371_v0 }
 0x4dd   : > { %v645_v5 = vcombine.high %v1681_v4, %v1371_v0  ;;  %v630_v7 = vcombine.high %v614_v3, %v1371_v0  ;;  %v629_v6 = vrot.slane %v615_v8, %v621_v63  ;;  %v637_v10 = vrot.slane %v614_v3, %v621_v63 }
 0x4df   : > { %650 = vrot.lane.b32.xlu1 %v645_v5, %s1378_s2  ;;  %v644_v9 = vrot.slane %v630_v7, %v621_v63  ;;  %v647_v11 = vcombine.high %v637_v10, %v1371_v0  ;;  %v646_v12 = vcombine.high %v629_v6, %v1371_v0 }
 0x4e1   : > { %666 = vrot.lane.b32.xlu0 %v644_v9, %s1374_s12  ;;  %v648_v13 = vcombine.high %v644_v9, %v1371_v0 }
 0x4e3   : > { %654 = vrot.lane.b32.xlu1 %v629_v6, %s1374_s12 }
 0x4e7   : > { %662 = vrot.lane.b32.xlu1 %v647_v11, %s1378_s2 }
 0x4eb   : > { %658 = vrot.lane.b32.xlu1 %v646_v12, %s1373_s13 }
 0x4ef   : > { %670 = vrot.lane.b32.xlu1 %v648_v13, %s1373_s13 }
 0x551   : > { %v651_v14 = vpop.permute.xlu1 %650 }
 0x555   : > { %v655_v15 = vpop.permute.xlu1 %654 }
 0x559   : > { %v663_v16 = vpop.permute.xlu1 %662 }
 0x55a   : > { %v678_v23 = vsel %vm368_vm1, %v637_v10, %v663_v16 }
 0x55b   : > { %v778_v19 = vpop.f32.mrb[8].mxu0 }
 0x55c   : > { %v782_v20 = vmul.f32 0.125, %v778_v19  ;;  %v1034_v21 = vpop.f32.mrb[9].mxu0 }
 0x55d   : > { %v659_v0 = vpop.permute.xlu1 %658 }
 0x55e   : > { %784 = vst.msk [vmem:[%s342_s11] sm:$0x1] %vm783_vm4, %v782_v20 }
 0x55f   : > { %1266 = shalt.err (!%p1263_p7)
}
 0x560   : > { %s1267_s27 = scalar_lea.hbm %s1699_s30, 16  ;;  %s1271_s12 = scalar_lea.hbm %s1791_s6, 32 }
 0x561   : > { %p1268_p1 = scmp.ne.s32.totalorder %s1699_s30, %s1267_s27  ;;  %p1272_p11 = scmp.lt.u32.totalorder %s1699_s30, %s1791_s6 }
 0x562   : > { %p1273_p9 = scmp.lt.u32.totalorder %s1271_s12, %s1267_s27  ;;  %p1275_p2 = scmp.lt.u32.totalorder %s1267_s27, %s1699_s30 }
 0x563   : > { %p1269_p0 = pnand %p1268_p1, %p1814_p13 }
 0x564   : > { %p1274_p12 = por %p1273_p9, %p1272_p11 }
 0x565   : > { %p1270_p8 = pneg %p1269_p0 }
 0x566   : > { %p1276_p6 = por %p1275_p2, %p1274_p12 }
 0x568   : > { %p1277_p10 = pnand %p1276_p6, %p1270_p8 }
 0x56a   : > { %1280 = shalt.err (!%p1277_p10)
}
 0x56b   : > { %1048 = dma.vmem_to_hbm [thread:$0]  (%p1814_p13), %s1701_s10, 16, %s1699_s30, %s791_s15   ;;  %v673_v24 = vsel %vm368_vm1, %v1681_v4, %v651_v14  ;;  %v667_v25 = vpop.permute.xlu0 %666  ;;  %v689_v28 = vsub.s32 %v686_v22, %v1672_v45  ;;  %v671_v29 = vpop.permute.xlu1 %670  ;;  %vm701_vm7 = vcmp.lt.s32.totalorder %v604_v44, 256 }
 0x56c   : > { %v675_v26 = vsel %vm674_vm5, %v673_v24, %v655_v15  ;;  %v679_v27 = vsel %vm674_vm5, %v678_v23, %v667_v25  ;;  %s989_s11 = sshll.u32 %s1438_s25, 5  ;;  %s336_s10 = scalar_lea.vmem [#allocation10], %s971_s3 }
 0x56d   : > { %v677_v30 = vsel %vm676_vm6, %v675_v26, %v659_v0  ;;  %v680_v31 = vsel %vm676_vm6, %v679_v27, %v671_v29  ;;  %s804_s14 = sshll.u32 %s336_s10, 4  ;;  %s1741_s15 = scalar_lea.hbm %s1790_s5, %s989_s11  ;;  %s1743_s14 = int_to_ptr.vmem [resolvable:$true] %s804_s14 }
 0x56e   : > { %v683_v32 = vcombine.low %v677_v30, %v680_v31  ;;  %s786_s17 = scalar_lea.sflag [#allocation4], %s1617_s20  ;;  %s1281_s25 = scalar_lea.vmem %s1743_s14, 32 }
 0x56f   : > { %p1282_p4 = scmp.ne.s32.totalorder %s1743_s14, %s1281_s25  ;;  %s1381_s3 = smov [#allocation10]  }
 0x570   : > { %v690_v33 = vrot.slane %v683_v32, %v689_v28  ;;  %s1285_s7 = sshll.u32 %s1381_s3, 4  ;;  %s1286_s7 = int_to_ptr.vmem [resolvable:$false] %s1285_s7 }
 0x571   : > { %p1283_p5 = pnand %p1282_p4, %p1814_p13  ;;  %s1287_s8 = scalar_lea.vmem %s1286_s7, 64 }
 0x572   : > { %v697_v34 = vrot.slane %v690_v33, %v689_v28  ;;  %p1288_p7 = scmp.lt.s32.totalorder %s1743_s14, %s1286_s7  ;;  %p1289_p1 = scmp.lt.s32.totalorder %s1287_s8, %s1281_s25 }
 0x573   : > { %p1284_p3 = pneg %p1283_p5 }
 0x574   : > { %703 = vst.msk [vmem:[%s336_s10] sm:$0x3] %vm701_vm7, %v697_v34  ;;  %p1290_p0 = por %p1289_p1, %p1288_p7 }
 0x576   : > { %p1291_p8 = pnand %p1290_p0, %p1284_p3 }
 0x578   : > { %1294 = shalt.err (!%p1291_p8)
}
 0x579   : > { %s1295_s20 = scalar_lea.hbm %s1741_s15, 32  ;;  %s1299_s18 = scalar_lea.hbm %s1790_s5, 64 }
 0x57a   : > { %p1296_p11 = scmp.ne.s32.totalorder %s1741_s15, %s1295_s20  ;;  %p1300_p2 = scmp.lt.u32.totalorder %s1741_s15, %s1790_s5 }
 0x57b   : > { %p1301_p6 = scmp.lt.u32.totalorder %s1299_s18, %s1295_s20  ;;  %p1303_p4 = scmp.lt.u32.totalorder %s1295_s20, %s1741_s15 }
 0x57c   : > { %p1297_p9 = pnand %p1296_p11, %p1814_p13 }
 0x57d   : > { %p1302_p10 = por %p1301_p6, %p1300_p2 }
 0x57e   : > { %p1298_p12 = pneg %p1297_p9 }
 0x57f   : > { %p1304_p5 = por %p1303_p4, %p1302_p10 }
 0x581   : > { %p1305_p3 = pnand %p1304_p5, %p1298_p12 }
 0x583   : > { %1308 = shalt.err (!%p1305_p3)
}
 0x584   : > { %1047 = dma.vmem_to_hbm [thread:$0]  (%p1814_p13), %s1743_s14, 32, %s1741_s15, %s786_s17  }
 0x585 PF: > { %s829_s2 = sand.u32 1, %s1351_s21   ;;  %p1815_p7 = scmp.ne.s32.totalorder %s1799_s28, 0 }
 0x586   : > { %p1816_p1 = scmp.ge.s32.totalorder %s1363_s24, 2  ;;  %s830_s19 = scalar_lea.sflag [#allocation4], %s829_s2 }
 0x588   : > { %p1066_p0 = pnand %p1816_p1, %p1815_p7 }
 0x58a   : > { %1342 = dma.done.wait (!%p1066_p0), %s830_s19, 32  }
 0x58b   : > { %1344 = vsyncadd (!%p1066_p0), %s830_s19, 4294967264  ;;  %s839_s11 = scalar_lea.sflag [#allocation12], %s829_s2 }
 0x58c   : > { %1346 = dma.done.wait (!%p1066_p0), %s839_s11, 16  }
 0x58d   : > { %1348 = vsyncadd (!%p1066_p0), %s839_s11, 4294967280  ;;  %s1817_s9 = sld [smem:[#allocation19_spill]]  ;;  %p27_p13 = scmp.ge.s32.totalorder %s1527_s26, 4  }
 0x58e   : > { %s1818_s21 = smov %s1355_s22  ;;  %s1819_s22 = smov %s1359_s23 }
 0x58f   : > { %s1821_s24 = smov %s1527_s26  ;;  %29 = sbr.rel (!%p27_p13) target bundleno = 13 (0xd), region = 123 }
 0x593   : > { %s1820_s23 = smov %s1817_s9 }
 0x596   :  { %843 = vsyncpa [#allocation3], 1 }
 0x597   :  { %845 = vsyncpa [#allocation3 + $0x1], 1 }
 0x598   :  { %846 = vsyncpa [#allocation6], 1 }
 0x599   :  { %848 = vsyncpa [#allocation6 + $0x1], 1 }
 0x59a   :  { %849 = vsyncpa [#allocation9], 1 }
 0x59b   :  { %850 = vsyncpa [#allocation4], 1 }
 0x59c   :  { %852 = vsyncpa [#allocation4 + $0x1], 1 }
 0x59d   :  { %853 = vsyncpa [#allocation12], 1 }
 0x59e   :  { %855 = vsyncpa [#allocation12 + $0x1], 1 }

</bundles_post_ra>
